<compile_context>
chip_gen: v7x
topology: tpu7x:2x2x1
jax: 0.10.0
libtpu: 0.0.40
codegen_flags: <defaults>
</compile_context>

<pallas_src>
import jax
import jax.numpy as jnp
from jax import lax
from jax.experimental import pallas as pl
from jax.experimental.pallas import tpu as pltpu


def _round_up(x: int, m: int) -> int:
    return ((x + m - 1) // m) * m


def _decoder_kernel(y_ref, upos_ref, emb_ref, w_ref, o_ref, acc_ref):
    """One (sequence-block i, vocab-chunk kv) grid step.

    y_ref   : (1, TM, 1) int32 tokens (TN sequences flattened seq-major, padded to TM)
    upos_ref: (TM, 1) int32 time index of each row within its own sequence
    emb_ref : (TK, D_pad) vocab chunk kv of the (padded, cast) embedding table
    w_ref   : (C, D_pad) depthwise conv taps; w[k] multiplies emb[u - (C-1-k)]
    o_ref   : (1, TM, D_pad) output tile (written only at the last vocab chunk)
    acc_ref : (TM, D_pad) f32 accumulator scratch (persistent across kv)
    """
    kv = pl.program_id(1)
    nk = pl.num_programs(1)
    tk = emb_ref.shape[0]
    tm = acc_ref.shape[0]
    C = w_ref.shape[0]

    @pl.when(kv == 0)
    def _init():
        acc_ref[...] = jnp.zeros_like(acc_ref)

    # One-hot in (TM, TK) orientation -> natural MXU (M,K)@(K,N), no transpose.
    tokens = y_ref[0]                                    # (TM, 1) int32
    local = tokens - kv * tk                             # token id within this chunk
    iota = lax.broadcasted_iota(jnp.int32, (tm, tk), 1)  # lane iota
    one_hot = (iota == local).astype(emb_ref.dtype)      # exact even in bf16
    acc_ref[...] += jnp.dot(one_hot, emb_ref[...],
                            preferred_element_type=jnp.float32)

    @pl.when(kv == nk - 1)
    def _finalize():
        emb = acc_ref[...]                               # (TM, D_pad) f32
        if C == 1:
            o_ref[0] = emb.astype(o_ref.dtype)
        else:
            u_pos = upos_ref[...]                        # (TM, 1)
            taps = w_ref[...]                            # (C, D_pad)
            res = emb * taps[C - 1][None, :]             # tap at the current step
            for k in range(C - 1):
                shift = C - 1 - k
                rolled = pltpu.roll(emb, shift=shift, axis=0)     # XLU rotate
                res = res + jnp.where(u_pos >= shift, rolled, 0.0) * taps[k][None, :]
            o_ref[0] = res.astype(o_ref.dtype)


def prepare_decoder_params(embedding, conv_w, *, context_size,
                           matmul_dtype=jnp.bfloat16, vocab_tile=1024):
    """Pad/cast the table and conv taps ONCE (hoisted out of the per-call path).

    embedding: (V, D) f32; conv_w: (C, D) f32 (conv_w[k, d] == torch weight[d, 0, k]),
    or None when context_size == 1.
    """
    V, D = embedding.shape
    C = int(context_size)
    assert C >= 1, C

    D_pad = pl.cdiv(D, 128) * 128                       # lane-dense output
    tk = min(_round_up(V, 8), _round_up(int(vocab_tile), 8))
    nk = pl.cdiv(V, tk)
    V_pad = nk * tk

    emb_p = jnp.pad(embedding.astype(jnp.float32),
                    ((0, V_pad - V), (0, D_pad - D))).astype(matmul_dtype)
    if C > 1:
        w_p = jnp.pad(conv_w.astype(jnp.float32), ((0, 0), (0, D_pad - D)))
    else:
        w_p = jnp.ones((1, D_pad), jnp.float32)          # unused identity tap

    return dict(emb=emb_p, w=w_p, V=V, D=D, C=C, D_pad=D_pad, tk=tk, nk=nk,
                matmul_dtype=matmul_dtype)


def _default_target_rows() -> int:
    # Fuller M dim for the 256-wide v6e/v7x MXU; 256 is enough on v5e.
    try:
        kind = jax.devices()[0].device_kind.lower()
        if ("v5e" in kind) or ("v5 lite" in kind) or ("v5lite" in kind):
            return 256
    except Exception:
        pass
    return 512


def _vmem_limit_bytes(tm_pad, tk, D_pad, C, m_it, o_it) -> int:
    col = tm_pad * 512                                    # (TM, 1) i32 tile (lane-padded)
    needed = (
        2 * tk * D_pad * m_it                             # double-buffered table chunk
        + 2 * col + 2 * col                               # tokens + u_pos blocks
        + 2 * max(C, 8) * D_pad * 4                       # conv taps
        + 2 * tm_pad * D_pad * o_it                       # output tile
        + tm_pad * D_pad * 4                              # f32 accumulator scratch
        + tm_pad * tk * (4 + m_it)                        # in-kernel iota + one-hot
        + 4 * tm_pad * D_pad * 4                          # matmul partial + conv temps
        + (4 << 20)                                       # compiler slack
    )
    try:
        cap = int(pltpu.get_tpu_info().vmem_capacity_bytes)
    except Exception:
        cap = 64 << 20
    # Leave headroom: at most ~3/4 of physical VMEM (v5e/v6e ~96 MiB, v7x ~48 MiB).
    return int(min(max(needed, 32 << 20), (cap * 3) // 4))


def decoder_forward(y, params, *, out_dtype=jnp.float32, target_rows=None):
    """y: (N, U) int32 tokens with blank prepended.

    Returns (N, U, D) == torch Decoder.forward(y, need_pad=True), in `out_dtype`.
    """
    N, U = y.shape
    emb_p, w_p = params["emb"], params["w"]
    V, D, C = params["V"], params["D"], params["C"]
    D_pad, tk, nk = params["D_pad"], params["tk"], params["nk"]
    m_it = jnp.dtype(params["matmul_dtype"]).itemsize
    o_it = jnp.dtype(out_dtype).itemsize

    if target_rows is None:
        target_rows = _default_target_rows()

    # Sequences per grid step; no forced multi-step split for tiny batches
    # (megacore splitting would only re-fetch the table per TC).
    tn = max(1, min(N, max(1, target_rows // max(U, 1))))
    g = pl.cdiv(N, tn)
    n_pad = g * tn
    tm = tn * U
    tm_pad = _round_up(tm, 8)                             # full-sublane stores

    # Tokens: (g, tm_pad, 1), sequence-major / time-minor; pad rows are discarded.
    y_p = y.astype(jnp.int32)
    if n_pad != N:
        y_p = jnp.pad(y_p, ((0, n_pad - N), (0, 0)))
    y_blk = y_p.reshape(g, tm)
    if tm_pad != tm:
        y_blk = jnp.pad(y_blk, ((0, 0), (0, tm_pad - tm)))
    y3 = y_blk.reshape(g, tm_pad, 1)

    # Per-row time index within its own sequence (causal mask for the conv).
    u_pos = jnp.tile(jnp.arange(U, dtype=jnp.int32), tn)
    if tm_pad != tm:
        u_pos = jnp.pad(u_pos, (0, tm_pad - tm))
    u_pos = u_pos.reshape(tm_pad, 1)

    tok_spec = pl.BlockSpec((1, tm_pad, 1), lambda i, k: (i, 0, 0))
    upos_spec = pl.BlockSpec((tm_pad, 1), lambda i, k: (0, 0))
    emb_spec = pl.BlockSpec((tk, D_pad), lambda i, k: (k, 0))
    w_spec = pl.BlockSpec((w_p.shape[0], D_pad), lambda i, k: (0, 0))
    out_spec = pl.BlockSpec((1, tm_pad, D_pad), lambda i, k: (i, 0, 0))

    vmem_limit = _vmem_limit_bytes(tm_pad, tk, D_pad, C, m_it, o_it)
    params_c = pltpu.CompilerParams(
        dimension_semantics=("parallel", "arbitrary"),
        vmem_limit_bytes=vmem_limit,
    )

    out = pl.pallas_call(
        _decoder_kernel,
        out_shape=jax.ShapeDtypeStruct((g, tm_pad, D_pad), out_dtype),
        grid_spec=pltpu.PrefetchScalarGridSpec(
            num_scalar_prefetch=0,
            grid=(g, nk),
            in_specs=[tok_spec, upos_spec, emb_spec, w_spec],
            out_specs=out_spec,
            scratch_shapes=[pltpu.VMEM((tm_pad, D_pad), jnp.float32)]),
        compiler_params=params_c,
    )(y3, u_pos, emb_p, w_p)

    out = out[:, :tm, :].reshape(n_pad, U, D_pad)[:N, :, :D]
    return out


def decoder_reference(y, embedding, conv_w, *, context_size):
    """Pure-JAX f32 reference mirroring the torch forward (need_pad=True)."""
    emb = jnp.take(embedding, y, axis=0)                  # (N, U, D)
    if context_size > 1:
        C = context_size
        U = y.shape[1]
        padded = jnp.pad(emb, ((0, 0), (C - 1, 0), (0, 0)))
        out = jnp.zeros_like(emb)
        for k in range(C):
            out = out + padded[:, k:k + U, :] * conv_w[k][None, None, :]
        return out
    return emb


if __name__ == "__main__":
    key = jax.random.PRNGKey(0)

    # ---- Config 1: module-shaped small case (N=2, U=8, V=16, D=32, C=2) ----
    N, U = 2, 8
    vocab_size, embedding_dim = 16, 32
    blank_id, context_size = 0, 2

    k_emb, k_w, k_y, key = jax.random.split(key, 4)
    embedding = jax.random.normal(k_emb, (vocab_size, embedding_dim), jnp.float32)
    embedding = embedding.at[blank_id].set(0.0)           # nn.Embedding padding_idx row
    conv_w = jax.random.normal(k_w, (context_size, embedding_dim), jnp.float32) * 0.1
    y = jax.random.randint(k_y, (N, U), 0, vocab_size, dtype=jnp.int32)
    y = y.at[:, 0].set(blank_id)                          # blank prepended

    ref = decoder_reference(y, embedding, conv_w, context_size=context_size)

    # Exact f32 path.
    p_f32 = prepare_decoder_params(embedding, conv_w, context_size=context_size,
                                   matmul_dtype=jnp.float32)
    out_f32 = jax.block_until_ready(decoder_forward(y, p_f32))
    assert out_f32.shape == (N, U, embedding_dim), out_f32.shape
    assert jnp.allclose(out_f32, ref, atol=1e-5, rtol=1e-5), "f32 mismatch vs reference"

    # Default bf16-table MXU path (one-hot exact; table rounded to bf16).
    p_bf16 = prepare_decoder_params(embedding, conv_w, context_size=context_size)
    out_bf16 = jax.block_until_ready(decoder_forward(y, p_bf16))
    assert out_bf16.shape == (N, U, embedding_dim), out_bf16.shape
    assert jnp.allclose(out_bf16, ref, atol=2e-2, rtol=2e-2), "bf16 mismatch vs reference"

    # ---- Config 2: streamed vocab tiling + ragged TM pad + C=3 + D pad ------
    N2, U2 = 3, 5
    V2, D2, C2 = 40, 48, 3
    k_e2, k_w2, k_y2, key = jax.random.split(key, 4)
    emb2 = jax.random.normal(k_e2, (V2, D2), jnp.float32)
    emb2 = emb2.at[0].set(0.0)
    w2 = jax.random.normal(k_w2, (C2, D2), jnp.float32) * 0.1
    y2 = jax.random.randint(k_y2, (N2, U2), 0, V2, dtype=jnp.int32)
    y2 = y2.at[:, 0].set(0)

    p2 = prepare_decoder_params(emb2, w2, context_size=C2,
                                matmul_dtype=jnp.float32, vocab_tile=16)  # nk=3 chunks
    out2 = jax.block_until_ready(decoder_forward(y2, p2))
    ref2 = decoder_reference(y2, emb2, w2, context_size=C2)
    assert out2.shape == (N2, U2, D2), out2.shape
    assert jnp.allclose(out2, ref2, atol=1e-5, rtol=1e-5), "V-tiled mismatch vs reference"

    # ---- Config 3: context_size == 1 (no conv) ------------------------------
    p3 = prepare_decoder_params(embedding, None, context_size=1,
                                matmul_dtype=jnp.float32)
    out3 = jax.block_until_ready(decoder_forward(y, p3))
    ref3 = decoder_reference(y, embedding, None, context_size=1)
    assert jnp.allclose(out3, ref3, atol=1e-5, rtol=1e-5), "C=1 mismatch vs reference"

    print("KERNEL_OK")
</pallas_src>

<mosaic_0001>
module attributes {stable_mosaic.version = 11 : i64} {
  func.func @_decoder_kernel(%arg0: i32, %arg1: i32, %arg2: memref<1x16x1xi32, #tpu.memory_space<vmem>>, %arg3: memref<16x1xi32, #tpu.memory_space<vmem>>, %arg4: memref<16x128xf32, #tpu.memory_space<vmem>>, %arg5: memref<2x128xf32, #tpu.memory_space<vmem>>, %arg6: memref<1x16x128xf32, #tpu.memory_space<vmem>>, %arg7: memref<16x128xf32, #tpu.memory_space<vmem>>) attributes {dimension_semantics = [#tpu.dimension_semantics<parallel>, #tpu.dimension_semantics<arbitrary>], iteration_bounds = array<i64: 1, 1>, scalar_prefetch = 0 : i64, scratch_operands = 1 : i64, tpu.core_type = #tpu.core_type<tc>, window_params = [{transform_indices = @transform_0, window_bounds = array<i64: 1, 16, 1>}, {pipeline_mode = #tpu.pipeline_mode<synchronous>, transform_indices = @transform_1, window_bounds = array<i64: 16, 1>}, {transform_indices = @transform_2, window_bounds = array<i64: 16, 128>}, {pipeline_mode = #tpu.pipeline_mode<synchronous>, transform_indices = @transform_3, window_bounds = array<i64: 2, 128>}, {transform_indices = @transform_4, window_bounds = array<i64: 1, 16, 128>}]} {
    %c0_i32 = arith.constant 0 : i32
    %0 = arith.cmpi eq, %arg1, %c0_i32 : i32
    %1 = arith.extui %0 : i1 to i32
    %c0_i32_0 = arith.constant 0 : i32
    %2 = arith.cmpi ne, %1, %c0_i32_0 : i32
    scf.if %2 {
      %cst_11 = arith.constant 0.000000e+00 : f32
      %21 = vector.broadcast %cst_11 : f32 to vector<16x128xf32>
      %c0_12 = arith.constant 0 : index
      %c0_13 = arith.constant 0 : index
      %22 = vector.load %arg7[%c0_12, %c0_13] : memref<16x128xf32, #tpu.memory_space<vmem>>, vector<16x128xf32>
      tpu.vector_store %arg7[%c0_12, %c0_13], %21 {strides = array<i32>} : memref<16x128xf32, #tpu.memory_space<vmem>>, vector<16x128xf32>,
    } else {
    }
    %c0 = arith.constant 0 : index
    %c0_1 = arith.constant 0 : index
    %c0_2 = arith.constant 0 : index
    %3 = vector.load %arg2[%c0, %c0_1, %c0_2] : memref<1x16x1xi32, #tpu.memory_space<vmem>>, vector<1x16x1xi32>
    %4 = vector.shape_cast %3 : vector<1x16x1xi32> to vector<16x1xi32>
    %c16_i32 = arith.constant 16 : i32
    %5 = arith.muli %arg1, %c16_i32 : i32
    %6 = vector.broadcast %5 : i32 to vector<16x1xi32>
    %7 = arith.subi %4, %6 : vector<16x1xi32>
    %8 = tpu.iota {dimensions = array<i32: 1>} : vector<16x16xi32>
    %9 = vector.broadcast %7 : vector<16x1xi32> to vector<16x16xi32>
    %10 = arith.cmpi eq, %8, %9 : vector<16x16xi32>
    %11 = arith.extui %10 : vector<16x16xi1> to vector<16x16xi32>
    %12 = arith.sitofp %11 : vector<16x16xi32> to vector<16x16xf32>
    %c0_3 = arith.constant 0 : index
    %c0_4 = arith.constant 0 : index
    %13 = vector.load %arg7[%c0_3, %c0_4] : memref<16x128xf32, #tpu.memory_space<vmem>>, vector<16x128xf32>
    %c0_5 = arith.constant 0 : index
    %c0_6 = arith.constant 0 : index
    %14 = vector.load %arg4[%c0_5, %c0_6] : memref<16x128xf32, #tpu.memory_space<vmem>>, vector<16x128xf32>
    %cst = arith.constant dense<0.000000e+00> : vector<16x128xf32>
    %15 = tpu.matmul %12, %14, %cst {dimension_numbers = #tpu.dot_dimension_numbers<[1], [0], [0], [1], [0, 0, 1, 1], [], []>} : vector<16x16xf32>, vector<16x128xf32>, vector<16x128xf32> -> vector<16x128xf32>
    %16 = arith.addf %13, %15 : vector<16x128xf32>
    %c0_7 = arith.constant 0 : index
    %c0_8 = arith.constant 0 : index
    %17 = vector.load %arg7[%c0_7, %c0_8] : memref<16x128xf32, #tpu.memory_space<vmem>>, vector<16x128xf32>
    tpu.vector_store %arg7[%c0_7, %c0_8], %16 {strides = array<i32>} : memref<16x128xf32, #tpu.memory_space<vmem>>, vector<16x128xf32>,
    %c0_i32_9 = arith.constant 0 : i32
    %18 = arith.cmpi eq, %arg1, %c0_i32_9 : i32
    %19 = arith.extui %18 : i1 to i32
    %c0_i32_10 = arith.constant 0 : i32
    %20 = arith.cmpi ne, %19, %c0_i32_10 : i32
    scf.if %20 {
      %c0_11 = arith.constant 0 : index
      %c0_12 = arith.constant 0 : index
      %21 = vector.load %arg7[%c0_11, %c0_12] : memref<16x128xf32, #tpu.memory_space<vmem>>, vector<16x128xf32>
      %c0_13 = arith.constant 0 : index
      %c0_14 = arith.constant 0 : index
      %22 = vector.load %arg3[%c0_13, %c0_14] : memref<16x1xi32, #tpu.memory_space<vmem>>, vector<16x1xi32>
      %c0_15 = arith.constant 0 : index
      %c0_16 = arith.constant 0 : index
      %23 = vector.load %arg5[%c0_15, %c0_16] : memref<2x128xf32, #tpu.memory_space<vmem>>, vector<2x128xf32>
      %24 = vector.extract_strided_slice %23 {offsets = [1, 0], sizes = [1, 128], strides = [1, 1]} : vector<2x128xf32> to vector<1x128xf32>
      %25 = vector.shape_cast %24 : vector<1x128xf32> to vector<128xf32>
      %26 = vector.shape_cast %25 : vector<128xf32> to vector<1x128xf32>
      %27 = vector.broadcast %26 : vector<1x128xf32> to vector<16x128xf32>
      %28 = arith.mulf %21, %27 : vector<16x128xf32>
      %c1_i32 = arith.constant 1 : i32
      %29 = tpu.dynamic_rotate %21 by %c1_i32 dim 0 : vector<16x128xf32>, i32 -> vector<16x128xf32>
      %c1_i32_17 = arith.constant 1 : i32
      %30 = vector.broadcast %c1_i32_17 : i32 to vector<16x1xi32>
      %31 = arith.cmpi sge, %22, %30 : vector<16x1xi32>
      %cst_18 = arith.constant 0.000000e+00 : f32
      %32 = vector.shape_cast %31 : vector<16x1xi1> to vector<16x1xi1>
      %33 = vector.broadcast %32 : vector<16x1xi1> to vector<16x128xi1>
      %34 = vector.broadcast %cst_18 : f32 to vector<16x128xf32>
      %35 = arith.select %33, %29, %34 : vector<16x128xi1>, vector<16x128xf32>
      %36 = vector.extract_strided_slice %23 {offsets = [0, 0], sizes = [1, 128], strides = [1, 1]} : vector<2x128xf32> to vector<1x128xf32>
      %37 = vector.shape_cast %36 : vector<1x128xf32> to vector<128xf32>
      %38 = vector.shape_cast %37 : vector<128xf32> to vector<1x128xf32>
      %39 = vector.broadcast %38 : vector<1x128xf32> to vector<16x128xf32>
      %40 = arith.mulf %35, %39 : vector<16x128xf32>
      %41 = arith.addf %28, %40 : vector<16x128xf32>
      %c0_19 = arith.constant 0 : index
      %c0_20 = arith.constant 0 : index
      %c0_21 = arith.constant 0 : index
      %42 = vector.load %arg6[%c0_19, %c0_20, %c0_21] : memref<1x16x128xf32, #tpu.memory_space<vmem>>, vector<1x16x128xf32>
      %43 = vector.shape_cast %42 : vector<1x16x128xf32> to vector<16x128xf32>
      %44 = vector.shape_cast %41 : vector<16x128xf32> to vector<1x16x128xf32>
      tpu.vector_store %arg6[%c0_19, %c0_20, %c0_21], %44 {strides = array<i32>} : memref<1x16x128xf32, #tpu.memory_space<vmem>>, vector<1x16x128xf32>,
    } else {
    }
    return
  }
  func.func @transform_0(%arg0: i32, %arg1: i32) -> (i32, i32, i32) {
    %c0_i32 = arith.constant 0 : i32
    %c0_i32_0 = arith.constant 0 : i32
    %c0_i32_1 = arith.constant 0 : i32
    return %arg0, %c0_i32, %c0_i32_0 : i32, i32, i32
  }
  func.func @transform_1(%arg0: i32, %arg1: i32) -> (i32, i32) {
    %c0_i32 = arith.constant 0 : i32
    %c0_i32_0 = arith.constant 0 : i32
    %c0_i32_1 = arith.constant 0 : i32
    return %c0_i32, %c0_i32_0 : i32, i32
  }
  func.func @transform_2(%arg0: i32, %arg1: i32) -> (i32, i32) {
    %c0_i32 = arith.constant 0 : i32
    %c0_i32_0 = arith.constant 0 : i32
    return %arg1, %c0_i32 : i32, i32
  }
  func.func @transform_3(%arg0: i32, %arg1: i32) -> (i32, i32) {
    %c0_i32 = arith.constant 0 : i32
    %c0_i32_0 = arith.constant 0 : i32
    %c0_i32_1 = arith.constant 0 : i32
    return %c0_i32, %c0_i32_0 : i32, i32
  }
  func.func @transform_4(%arg0: i32, %arg1: i32) -> (i32, i32, i32) {
    %c0_i32 = arith.constant 0 : i32
    %c0_i32_0 = arith.constant 0 : i32
    %c0_i32_1 = arith.constant 0 : i32
    return %arg0, %c0_i32, %c0_i32_0 : i32, i32, i32
  }
}

</mosaic_0001>

<bundles_post_ra>
// kernel: tpu_custom_call.1
= control target key start
LH: loop header
LB: loop body
LE: loop exit
PB: predicated region body
PF: predicated region fallthrough
CT: control target
= control target key end

     0   :  { %s308_s0 = inlined_call_operand.vmem [shape: s32[1,16,1], index: 0, kind: input, shape index: {}]   ;;  %s309_s1 = inlined_call_operand.vmem [shape: s32[16,1], index: 1, kind: input, shape index: {}]   ;;  %s310_s2 = inlined_call_operand.vmem [shape: f32[16,128], index: 2, kind: input, shape index: {}]   ;;  %s311_s3 = inlined_call_operand.vmem [shape: f32[2,128], index: 3, kind: input, shape index: {}]   ;;  %s312_s4 = inlined_call_operand.hbm [shape: f32[1,16,128], index: 4, kind: output, shape index: {}]  }
   0x1   :  { %v24_v0 = vld [vmem:[%s308_s0] sm:$0xff] }
   0x2   :  { %9 = vsyncpa [#allocation4], 0  ;;  %v245_v1 = vmov 0   ;;  %v46_v2 = vld [vmem:[%s310_s2] sm:$0xff]  ;;  %v47_v3 = vld [vmem:[%s310_s2 + $0x8] sm:$0xff]  ;;  %v30_v10 = vlaneseq  ;;  %vm48_vm2 = vcmask 130048  }
   0x3   :  { %219 = vset.pattern.permute.xlu0 %v245_v1  ;;  %220 = vset.pattern.permute.xlu1 %v245_v1  ;;  %v210_v4 = vpack.c.bf16 %v47_v3, %v46_v2  ;;  %v25_v5 = vld [vmem:[%s308_s0 + $0x8] sm:$0xff]  ;;  %v139_v6 = vld [vmem:[%s309_s1] sm:$0xff]  ;;  %v246_v13 = vmov 0.0   ;;  %s247_s2 = smov [#allocation3]  }
   0x4   :  { %33 = vperm.xlu0 %219, %v24_v0   ;;  %v140_v7 = vld [vmem:[%s309_s1 + $0x8] sm:$0xff]  ;;  %vm155_vm0 = vcmp.ge.s32.totalorder %v139_v6, 1  ;;  %v31_v11 = vand.u32 127, %v30_v10  ;;  %v143_v17 = vshrl.u32 %v30_v10, 7  ;;  %v141_v19 = vld [vmem:[%s311_s3] sm:$0x3] }
   0x5   :  { %211 = vmatprep.subr.bf16.mxu0 %v210_v4  ;;  %vm156_vm1 = vcmp.ge.s32.totalorder %v140_v7, 1  ;;  %v157_v8 = vsel %vm155_vm0, 1, %v245_v1  ;;  %s184_s27 = sshll.u32 %s247_s2, 4  ;;  %s185_s27 = int_to_ptr.vmem [resolvable:$true] %s184_s27 }
   0x6   :  { %213 = vmatpush3.bf16.msra.mxu0 %v210_v4  ;;  %160 = vperm.xlu1 %220, %v157_v8   ;;  %v158_v9 = vsel %vm156_vm1, 1, %v245_v1  ;;  %v144_v18 = vsub.s32 1, %v143_v17  ;;  %v171_v22 = vsub.s32 0, %v143_v17  ;;  %vm152_vm5 = vcmp.lt.s32.totalorder %v143_v17, 1  ;;  %s221_s3 = scalar_lea.vmem %s185_s27, 256  ;;  %p226_p1 = scmp.lt.s32.totalorder %s185_s27, %s185_s27 }
   0x7   :  { %p222_p0 = scmp.ne.s32.totalorder %s185_s27, %s221_s3  ;;  %p227_p2 = scmp.lt.s32.totalorder %s221_s3, %s221_s3 }
   0x8   :  { %36 = vperm.xlu0 %219, %v25_v5   ;;  %v145_v21 = vrot.slane %v141_v19, %v144_v18  ;;  %v172_v28 = vrot.slane %v141_v19, %v171_v22 }
   0x9   :  { %p228_p3 = por %p227_p2, %p226_p1 }
   0xa   :  { %163 = vperm.xlu1 %220, %v158_v9  }
   0xb   :  { %p229_p4 = pnand %p228_p3, %p222_p0 }
  0x83   :  { %v34_v12 = vpop.permute.xlu0 %33 }
  0x84   :  { %vm38_vm3 = vcmp.eq.s32.totalorder %v31_v11, %v34_v12 }
  0x85   :  { %v195_v14 = vsel %vm38_vm3, 1.0, %v246_v13  ;;  %v161_v20 = vpop.permute.xlu1 %160 }
  0x86   :  { %207 = vmatprep.mubr.msk.f32.mxu0 %vm48_vm2, %v195_v14  ;;  %vm165_vm6 = vcmp.eq.s32.totalorder %v161_v20, 1 }
  0x87   :  { %v37_v15 = vpop.permute.xlu0 %36 }
  0x88   :  { %vm39_vm4 = vcmp.eq.s32.totalorder %v31_v11, %v37_v15 }
  0x89   :  { %v196_v16 = vsel %vm39_vm4, 1.0, %v246_v13  ;;  %v164_v24 = vpop.permute.xlu1 %163 }
  0x8a   :  { %208 = vmatmul.mubr.msk.f32.vlgmr.msra.gmra.mrb[0].mxu0 %vm48_vm2, %v196_v16  ;;  %vm166_vm7 = vcmp.eq.s32.totalorder %v164_v24, 1 }
 0x15d   :  { %v209_v23 = vpop.f32.mrb[0].mxu0 }
 0x15e   :  { %v147_v25 = vmul.f32 %v209_v23, %v145_v21  ;;  %v149_v26 = vrot.slane %v209_v23, 7  ;;  %v121_v27 = vpop.f32.mrb[1].mxu0 }
 0x15f   :  { %v146_v29 = vmul.f32 %v145_v21, %v121_v27  ;;  %v148_v30 = vrot.slane %v121_v27, 7 }
 0x161   :  { %v153_v31 = vsel %vm152_vm5, %v148_v30, %v149_v26  ;;  %v154_v32 = vsel %vm152_vm5, %v149_v26, %v148_v30 }
 0x162   :  { %v167_v33 = vsel %vm165_vm6, %v154_v32, 0.0  ;;  %v168_v34 = vsel %vm166_vm7, %v153_v31, 0.0 }
 0x163   :  { %v173_v35 = vmul.f32 %v172_v28, %v167_v33  ;;  %v174_v36 = vmul.f32 %v172_v28, %v168_v34 }
 0x165   :  { %v175_v37 = vadd.f32 %v173_v35, %v146_v29  ;;  %v176_v38 = vadd.f32 %v174_v36, %v147_v25 }
 0x167   :  { %177 = vst [vmem:[#allocation3] sm:$0xff] %v175_v37  ;;  %178 = vst [vmem:[#allocation3 + $0x8] sm:$0xff] %v176_v38 }
 0x168   :  { %232 = shalt.err (!%p229_p4)
}
 0x169   :  { %s233_s30 = scalar_lea.hbm %s312_s4, 256 }
 0x16a   :  { %p234_p5 = scmp.ne.s32.totalorder %s312_s4, %s233_s30  ;;  %p237_p6 = scmp.lt.u32.totalorder %s233_s30, %s312_s4 }
 0x16c   :  { %p239_p7 = pnand %p237_p6, %p234_p5 }
 0x16e   :  { %242 = shalt.err (!%p239_p7)
}
 0x16f   :  { %s248_s9 = smov 128   ;;  %s249_s10 = smov 8  }
 0x170   :  { %190 = dma.vmem_to_hbm [thread:$0]  %s185_s27, 256, %s312_s4, [#allocation4], %s248_s9, %s248_s9, %s249_s10  }
 0x171   :  { %243 = dma.done.wait [#allocation4], 256  }
 0x172   :  { %244 = vsyncadd [#allocation4], 4294967040 }
 0x173   :  { %194 = vsyncpa [#allocation4], 1 }

</bundles_post_ra>
